<compile_context>
chip_gen: v6e
topology: v6e:2x2x1
jax: 0.10.0
libtpu: 0.0.40
codegen_flags: <defaults>
</compile_context>

<pallas_src>
import functools

import numpy as np

import jax
import jax.numpy as jnp
from jax.experimental import pallas as pl
from jax.experimental.pallas import tpu as pltpu


def _round_up(x, m):
    return (x + m - 1) // m * m


def _convblock_kernel(x_ref, t_ref, b_ref, o_ref, act_ref, *,
                      H, WC, L, KH, oh, roffs):
    """Fused L x (dilated 'same' conv + bias + ReLU) for a block of NB images.

    x_ref  : (NB, Hpp, WtC)   zero-padded input canvases (compute dtype)
    t_ref  : (L*KH, WtC, WtC) stacked block-Toeplitz weights (kw + Cin folded into K)
    b_ref  : (L, 1, WtC)      per-layer bias rows, pre-placed at the output lanes (f32)
    o_ref  : (NB, H, WC)      lane-dense outputs (WC = W * C)
    act_ref: (Hpp, WtC)       activation canvas scratch (compute dtype)
    """
    NB = x_ref.shape[0]
    WtC = act_ref.shape[1]
    for b in range(NB):
        # Full-canvas copy: brings the image in AND refreshes the zero border rows,
        # so nothing else ever needs re-zeroing (robust across megacore sharding).
        act_ref[...] = x_ref[b].astype(act_ref.dtype)
        for layer in range(L):
            # f32 accumulator initialized with the (pre-placed, halo-zero) bias row.
            acc = jnp.broadcast_to(b_ref[layer].astype(jnp.float32), (H, WtC))
            for kh in range(KH):
                r0 = roffs[kh]
                # Row-shifted slab; kw shifts are already folded into t_ref, so this
                # is the ONLY shifted read per (layer, kh) -- a few vregs of relayout.
                a = act_ref[r0:r0 + H, :]
                acc = acc + jax.lax.dot_general(
                    a, t_ref[layer * KH + kh],
                    dimension_numbers=(((1,), (0,)), ((), ())),
                    preferred_element_type=jnp.float32)
            y = jnp.maximum(acc, 0.0)
            if layer == L - 1:
                # Last layer's Toeplitz writes its output at lane offset 0, so this
                # is an aligned, lane-dense slice/store.
                o_ref[b] = y[:, :WC].astype(o_ref.dtype)
            else:
                # 8-aligned interior rows, full lane width; halo columns of y are
                # zero by construction of T, so borders stay zero for the next layer.
                act_ref[oh:oh + H, :] = y.astype(act_ref.dtype)


def conv_block_fused(x_canvas, t_stack, b_stack, *, H, WC, L, KH, oh, roffs,
                     batch_block=1, compute_dtype=jnp.float32):
    """Run the whole ConvBlock in one pallas_call, gridded over batch blocks."""
    N, Hpp, WtC = x_canvas.shape
    nb = batch_block if (batch_block > 0 and N % batch_block == 0) else 1

    kernel = functools.partial(_convblock_kernel, H=H, WC=WC, L=L, KH=KH,
                               oh=oh, roffs=tuple(roffs))
    out = pl.pallas_call(
        kernel,
        out_shape=jax.ShapeDtypeStruct((N, H, WC), jnp.float32),
        grid_spec=pltpu.PrefetchScalarGridSpec(
            num_scalar_prefetch=0,
            grid=(N // nb,),
            in_specs=[
                # nb images per step; true-width canvas block (no 128-channel pad).
                pl.BlockSpec((nb, Hpp, WtC), lambda n: (n, 0, 0)),
                # Constant index maps -> weights/biases DMA'd into VMEM only once.
                # TODO(synk): pipeline_mode=pl.Buffered(1) to drop the 2nd buffer.
                pl.BlockSpec((L * KH, WtC, WtC), lambda n: (0, 0, 0)),
                pl.BlockSpec((L, 1, WtC), lambda n: (0, 0, 0)),
            ],
            # Lane-dense output slab (W*C lanes), unmasked full-lane stores.
            out_specs=pl.BlockSpec((nb, H, WC), lambda n: (n, 0, 0)),
            scratch_shapes=[pltpu.VMEM((Hpp, WtC), compute_dtype)],
        ),
        compiler_params=pltpu.CompilerParams(
            dimension_semantics=("parallel",),        # megacore: both v7x TCs get work
            vmem_limit_bytes=32 * 1024 * 1024,        # actual use ~2 MiB; generous cap
        ),
    )(x_canvas.astype(compute_dtype),
      t_stack.astype(compute_dtype),
      b_stack.astype(jnp.float32))
    return out


class ConvBlockPallas:
    """JAX/Pallas port of the PyTorch ConvBlock (n_conv x [Conv2d(same, dilated) + ReLU])."""

    def __init__(self, n_filters, n_conv, dilated_rate, kernel_size,
                 first_layer=False, key=jax.random.PRNGKey(0),
                 compute_dtype=jnp.float32):
        self.n_filters = n_filters
        self.n_conv = n_conv
        self.dilation = dilated_rate
        self.kernel_size = kernel_size
        self.compute_dtype = compute_dtype

        self.params = []   # original (KH, KW, Cin, Cout) weights + (Cout,) biases
        self.cins = []
        for i in range(n_conv):
            cin = (1 if i == 0 else n_filters) if first_layer else n_filters
            self.cins.append(cin)
            key, kw_key, kb_key = jax.random.split(key, 3)
            fan_in = cin * kernel_size * kernel_size
            bound = float(fan_in) ** -0.5
            w = jax.random.uniform(kw_key, (kernel_size, kernel_size, cin, n_filters),
                                   jnp.float32, -bound, bound)
            b = jax.random.uniform(kb_key, (n_filters,), jnp.float32, -bound, bound)
            self.params.append((w, b))

        self._plan_cache = {}   # (H, W) -> geometry + stacked Toeplitz weights/biases

    def _plan(self, H, W):
        """Build (and cache) the width-specialized block-Toeplitz weights & geometry."""
        cache_key = (H, W)
        if cache_key in self._plan_cache:
            return self._plan_cache[cache_key]

        K, d, L, C = self.kernel_size, self.dilation, self.n_conv, self.n_filters
        tot = d * (K - 1)                      # padding='same', stride 1
        p_lo, p_hi = tot // 2, tot - tot // 2
        Wt = W + tot                           # canvas width in pixels (horiz. halo)
        WtC = Wt * C                           # canvas width in lanes
        WC = W * C
        oh = _round_up(p_lo, 8)                # 8-aligned interior row origin
        Hpp = _round_up(oh + H + p_hi, 8)      # canvas height (sublane-tile aligned)
        roffs = tuple(oh - p_lo + kh * d for kh in range(K))

        t_np = np.zeros((L, K, WtC, WtC), np.float32)
        b_np = np.zeros((L, 1, WtC), np.float32)
        for layer, (w, b) in enumerate(self.params):
            cin = self.cins[layer]
            w_np = np.asarray(w)               # (K, K, cin, C)
            b_vec = np.asarray(b)              # (C,)
            # Inner layers write back into the canvas at column offset p_lo (so the
            # writeback is a full-width row store); the last layer writes at offset 0
            # (so the final output slice is an aligned lane-dense slab).
            out_off = 0 if layer == L - 1 else p_lo
            for kh in range(K):
                for kw in range(K):
                    for wcol in range(W):
                        ic = wcol + kw * d     # canvas input column (pixels)
                        oc = out_off + wcol    # canvas output column (pixels)
                        t_np[layer, kh, ic * C:ic * C + cin, oc * C:oc * C + C] += \
                            w_np[kh, kw]
            for wcol in range(W):
                oc = out_off + wcol
                b_np[layer, 0, oc * C:oc * C + C] = b_vec

        plan = dict(H=H, W=W, WC=WC, WtC=WtC, Hpp=Hpp, oh=oh,
                    p_lo=p_lo, p_hi=p_hi, roffs=roffs,
                    t_stack=jnp.asarray(t_np.reshape(L * K, WtC, WtC)),
                    b_stack=jnp.asarray(b_np))
        self._plan_cache[cache_key] = plan
        return plan

    def __call__(self, x_nchw, batch_block=1):
        N, cin0, H, W = x_nchw.shape
        C = self.n_filters
        p = self._plan(H, W)
        # Host-side canvas build (tiny): NCHW -> NHWC, pad channels to C (8, not 128!),
        # add the horizontal halo, fold (W, C) into the lane dim, add the vertical halo.
        x = jnp.transpose(x_nchw, (0, 2, 3, 1))
        x = jnp.pad(x, ((0, 0), (0, 0), (0, 0), (0, C - cin0)))
        x = jnp.pad(x, ((0, 0), (0, 0), (p['p_lo'], p['p_hi']), (0, 0)))
        x = x.reshape(N, H, p['WtC'])
        x = jnp.pad(x, ((0, 0), (p['oh'], p['Hpp'] - p['oh'] - H), (0, 0)))

        y = conv_block_fused(x, p['t_stack'], p['b_stack'],
                             H=H, WC=p['WC'], L=self.n_conv, KH=self.kernel_size,
                             oh=p['oh'], roffs=p['roffs'],
                             batch_block=batch_block,
                             compute_dtype=self.compute_dtype)
        # (N, H, W*C) -> (N, C, H, W); C == n_filters, so no channel slice is needed.
        return jnp.transpose(y.reshape(N, H, W, C), (0, 3, 1, 2))


def _reference_forward(x_nchw, block):
    """Pure-JAX reference (lax.conv_general_dilated) matching PyTorch semantics."""
    x = x_nchw
    for w, b in block.params:
        K = w.shape[0]
        d = block.dilation
        tot = d * (K - 1)
        pad = (tot // 2, tot - tot // 2)
        y = jax.lax.conv_general_dilated(
            x, w, window_strides=(1, 1), padding=(pad, pad),
            rhs_dilation=(d, d),
            dimension_numbers=("NCHW", "HWIO", "NCHW"),
        )
        x = jnp.maximum(y + b.reshape(1, -1, 1, 1), 0.0)
    return x


if __name__ == "__main__":
    # Small shapes consistent with the module: first_layer=True -> 1 input channel.
    n_filters, n_conv, dilated_rate, kernel_size = 8, 2, 2, 3
    N, H, W = 2, 16, 16

    block = ConvBlockPallas(n_filters, n_conv, dilated_rate, kernel_size,
                            first_layer=True, key=jax.random.PRNGKey(0))

    x = jax.random.normal(jax.random.PRNGKey(0), (N, 1, H, W), jnp.float32)
    out = jax.block_until_ready(block(x))
    ref = jax.block_until_ready(_reference_forward(x, block))
    assert out.shape == (N, n_filters, H, W)
    assert jnp.allclose(out, ref, atol=2e-4, rtol=2e-4)

    # Also exercise batch blocking (2 images per grid step, grid still has 2 steps).
    x4 = jax.random.normal(jax.random.PRNGKey(1), (4, 1, H, W), jnp.float32)
    out4 = jax.block_until_ready(block(x4, batch_block=2))
    ref4 = jax.block_until_ready(_reference_forward(x4, block))
    assert jnp.allclose(out4, ref4, atol=2e-4, rtol=2e-4)

    print("KERNEL_OK")
</pallas_src>

<mosaic_0001>
module attributes {stable_mosaic.version = 11 : i64} {
  func.func @_convblock_kernel(%arg0: i32, %arg1: memref<1x32x160xf32, #tpu.memory_space<vmem>>, %arg2: memref<6x160x160xf32, #tpu.memory_space<vmem>>, %arg3: memref<2x1x160xf32, #tpu.memory_space<vmem>>, %arg4: memref<1x16x128xf32, #tpu.memory_space<vmem>>, %arg5: memref<32x160xf32, #tpu.memory_space<vmem>>) attributes {dimension_semantics = [#tpu.dimension_semantics<parallel>], iteration_bounds = array<i64: 2>, scalar_prefetch = 0 : i64, scratch_operands = 1 : i64, tpu.core_type = #tpu.core_type<tc>, window_params = [{transform_indices = @transform_0, window_bounds = array<i64: 1, 32, 160>}, {pipeline_mode = #tpu.pipeline_mode<synchronous>, transform_indices = @transform_1, window_bounds = array<i64: 6, 160, 160>}, {pipeline_mode = #tpu.pipeline_mode<synchronous>, transform_indices = @transform_2, window_bounds = array<i64: 2, 1, 160>}, {transform_indices = @transform_3, window_bounds = array<i64: 1, 16, 128>}]} {
    %c0 = arith.constant 0 : index
    %c0_0 = arith.constant 0 : index
    %c0_1 = arith.constant 0 : index
    %0 = vector.load %arg1[%c0, %c0_0, %c0_1] : memref<1x32x160xf32, #tpu.memory_space<vmem>>, vector<1x32x160xf32>
    %1 = vector.shape_cast %0 : vector<1x32x160xf32> to vector<32x160xf32>
    %c0_2 = arith.constant 0 : index
    %c0_3 = arith.constant 0 : index
    %2 = vector.load %arg5[%c0_2, %c0_3] : memref<32x160xf32, #tpu.memory_space<vmem>>, vector<32x160xf32>
    tpu.vector_store %arg5[%c0_2, %c0_3], %1 {strides = array<i32>} : memref<32x160xf32, #tpu.memory_space<vmem>>, vector<32x160xf32>,
    %c0_4 = arith.constant 0 : index
    %c0_5 = arith.constant 0 : index
    %c0_6 = arith.constant 0 : index
    %3 = vector.load %arg3[%c0_4, %c0_5, %c0_6] : memref<2x1x160xf32, #tpu.memory_space<vmem>>, vector<1x1x160xf32>
    %4 = vector.shape_cast %3 : vector<1x1x160xf32> to vector<1x160xf32>
    %5 = vector.shape_cast %4 : vector<1x160xf32> to vector<1x160xf32>
    %6 = vector.broadcast %5 : vector<1x160xf32> to vector<16x160xf32>
    %c6 = arith.constant 6 : index
    %c0_7 = arith.constant 0 : index
    %7 = vector.load %arg5[%c6, %c0_7] : memref<32x160xf32, #tpu.memory_space<vmem>>, vector<16x160xf32>
    %c0_8 = arith.constant 0 : index
    %c0_9 = arith.constant 0 : index
    %c0_10 = arith.constant 0 : index
    %8 = vector.load %arg2[%c0_8, %c0_9, %c0_10] : memref<6x160x160xf32, #tpu.memory_space<vmem>>, vector<1x160x160xf32>
    %9 = vector.shape_cast %8 : vector<1x160x160xf32> to vector<160x160xf32>
    %cst = arith.constant dense<0.000000e+00> : vector<16x160xf32>
    %10 = tpu.matmul %7, %9, %cst {dimension_numbers = #tpu.dot_dimension_numbers<[1], [0], [0], [1], [0, 0, 1, 1], [], []>} : vector<16x160xf32>, vector<160x160xf32>, vector<16x160xf32> -> vector<16x160xf32>
    %11 = arith.addf %6, %10 : vector<16x160xf32>
    %c8 = arith.constant 8 : index
    %c0_11 = arith.constant 0 : index
    %12 = vector.load %arg5[%c8, %c0_11] : memref<32x160xf32, #tpu.memory_space<vmem>>, vector<16x160xf32>
    %c1 = arith.constant 1 : index
    %c0_12 = arith.constant 0 : index
    %c0_13 = arith.constant 0 : index
    %13 = vector.load %arg2[%c1, %c0_12, %c0_13] : memref<6x160x160xf32, #tpu.memory_space<vmem>>, vector<1x160x160xf32>
    %14 = vector.shape_cast %13 : vector<1x160x160xf32> to vector<160x160xf32>
    %cst_14 = arith.constant dense<0.000000e+00> : vector<16x160xf32>
    %15 = tpu.matmul %12, %14, %cst_14 {dimension_numbers = #tpu.dot_dimension_numbers<[1], [0], [0], [1], [0, 0, 1, 1], [], []>} : vector<16x160xf32>, vector<160x160xf32>, vector<16x160xf32> -> vector<16x160xf32>
    %16 = arith.addf %11, %15 : vector<16x160xf32>
    %c10 = arith.constant 10 : index
    %c0_15 = arith.constant 0 : index
    %17 = vector.load %arg5[%c10, %c0_15] : memref<32x160xf32, #tpu.memory_space<vmem>>, vector<16x160xf32>
    %c2 = arith.constant 2 : index
    %c0_16 = arith.constant 0 : index
    %c0_17 = arith.constant 0 : index
    %18 = vector.load %arg2[%c2, %c0_16, %c0_17] : memref<6x160x160xf32, #tpu.memory_space<vmem>>, vector<1x160x160xf32>
    %19 = vector.shape_cast %18 : vector<1x160x160xf32> to vector<160x160xf32>
    %cst_18 = arith.constant dense<0.000000e+00> : vector<16x160xf32>
    %20 = tpu.matmul %17, %19, %cst_18 {dimension_numbers = #tpu.dot_dimension_numbers<[1], [0], [0], [1], [0, 0, 1, 1], [], []>} : vector<16x160xf32>, vector<160x160xf32>, vector<16x160xf32> -> vector<16x160xf32>
    %21 = arith.addf %16, %20 : vector<16x160xf32>
    %cst_19 = arith.constant 0.000000e+00 : f32
    %22 = vector.broadcast %cst_19 : f32 to vector<16x160xf32>
    %23 = arith.maximumf %21, %22 : vector<16x160xf32>
    %c8_20 = arith.constant 8 : index
    %c0_21 = arith.constant 0 : index
    %24 = vector.load %arg5[%c8_20, %c0_21] : memref<32x160xf32, #tpu.memory_space<vmem>>, vector<16x160xf32>
    tpu.vector_store %arg5[%c8_20, %c0_21], %23 {strides = array<i32>} : memref<32x160xf32, #tpu.memory_space<vmem>>, vector<16x160xf32>,
    %c1_22 = arith.constant 1 : index
    %c0_23 = arith.constant 0 : index
    %c0_24 = arith.constant 0 : index
    %25 = vector.load %arg3[%c1_22, %c0_23, %c0_24] : memref<2x1x160xf32, #tpu.memory_space<vmem>>, vector<1x1x160xf32>
    %26 = vector.shape_cast %25 : vector<1x1x160xf32> to vector<1x160xf32>
    %27 = vector.shape_cast %26 : vector<1x160xf32> to vector<1x160xf32>
    %28 = vector.broadcast %27 : vector<1x160xf32> to vector<16x160xf32>
    %c6_25 = arith.constant 6 : index
    %c0_26 = arith.constant 0 : index
    %29 = vector.load %arg5[%c6_25, %c0_26] : memref<32x160xf32, #tpu.memory_space<vmem>>, vector<16x160xf32>
    %c3 = arith.constant 3 : index
    %c0_27 = arith.constant 0 : index
    %c0_28 = arith.constant 0 : index
    %30 = vector.load %arg2[%c3, %c0_27, %c0_28] : memref<6x160x160xf32, #tpu.memory_space<vmem>>, vector<1x160x160xf32>
    %31 = vector.shape_cast %30 : vector<1x160x160xf32> to vector<160x160xf32>
    %cst_29 = arith.constant dense<0.000000e+00> : vector<16x160xf32>
    %32 = tpu.matmul %29, %31, %cst_29 {dimension_numbers = #tpu.dot_dimension_numbers<[1], [0], [0], [1], [0, 0, 1, 1], [], []>} : vector<16x160xf32>, vector<160x160xf32>, vector<16x160xf32> -> vector<16x160xf32>
    %33 = arith.addf %28, %32 : vector<16x160xf32>
    %c8_30 = arith.constant 8 : index
    %c0_31 = arith.constant 0 : index
    %34 = vector.load %arg5[%c8_30, %c0_31] : memref<32x160xf32, #tpu.memory_space<vmem>>, vector<16x160xf32>
    %c4 = arith.constant 4 : index
    %c0_32 = arith.constant 0 : index
    %c0_33 = arith.constant 0 : index
    %35 = vector.load %arg2[%c4, %c0_32, %c0_33] : memref<6x160x160xf32, #tpu.memory_space<vmem>>, vector<1x160x160xf32>
    %36 = vector.shape_cast %35 : vector<1x160x160xf32> to vector<160x160xf32>
    %cst_34 = arith.constant dense<0.000000e+00> : vector<16x160xf32>
    %37 = tpu.matmul %34, %36, %cst_34 {dimension_numbers = #tpu.dot_dimension_numbers<[1], [0], [0], [1], [0, 0, 1, 1], [], []>} : vector<16x160xf32>, vector<160x160xf32>, vector<16x160xf32> -> vector<16x160xf32>
    %38 = arith.addf %33, %37 : vector<16x160xf32>
    %c10_35 = arith.constant 10 : index
    %c0_36 = arith.constant 0 : index
    %39 = vector.load %arg5[%c10_35, %c0_36] : memref<32x160xf32, #tpu.memory_space<vmem>>, vector<16x160xf32>
    %c5 = arith.constant 5 : index
    %c0_37 = arith.constant 0 : index
    %c0_38 = arith.constant 0 : index
    %40 = vector.load %arg2[%c5, %c0_37, %c0_38] : memref<6x160x160xf32, #tpu.memory_space<vmem>>, vector<1x160x160xf32>
    %41 = vector.shape_cast %40 : vector<1x160x160xf32> to vector<160x160xf32>
    %cst_39 = arith.constant dense<0.000000e+00> : vector<16x160xf32>
    %42 = tpu.matmul %39, %41, %cst_39 {dimension_numbers = #tpu.dot_dimension_numbers<[1], [0], [0], [1], [0, 0, 1, 1], [], []>} : vector<16x160xf32>, vector<160x160xf32>, vector<16x160xf32> -> vector<16x160xf32>
    %43 = arith.addf %38, %42 : vector<16x160xf32>
    %cst_40 = arith.constant 0.000000e+00 : f32
    %44 = vector.broadcast %cst_40 : f32 to vector<16x160xf32>
    %45 = arith.maximumf %43, %44 : vector<16x160xf32>
    %46 = vector.extract_strided_slice %45 {offsets = [0, 0], sizes = [16, 128], strides = [1, 1]} : vector<16x160xf32> to vector<16x128xf32>
    %c0_41 = arith.constant 0 : index
    %c0_42 = arith.constant 0 : index
    %c0_43 = arith.constant 0 : index
    %47 = vector.load %arg4[%c0_41, %c0_42, %c0_43] : memref<1x16x128xf32, #tpu.memory_space<vmem>>, vector<1x16x128xf32>
    %48 = vector.shape_cast %47 : vector<1x16x128xf32> to vector<16x128xf32>
    %49 = vector.shape_cast %46 : vector<16x128xf32> to vector<1x16x128xf32>
    tpu.vector_store %arg4[%c0_41, %c0_42, %c0_43], %49 {strides = array<i32>} : memref<1x16x128xf32, #tpu.memory_space<vmem>>, vector<1x16x128xf32>,
    return
  }
  func.func @transform_0(%arg0: i32) -> (i32, i32, i32) {
    %c0_i32 = arith.constant 0 : i32
    %c0_i32_0 = arith.constant 0 : i32
    %c0_i32_1 = arith.constant 0 : i32
    return %arg0, %c0_i32, %c0_i32_0 : i32, i32, i32
  }
  func.func @transform_1(%arg0: i32) -> (i32, i32, i32) {
    %c0_i32 = arith.constant 0 : i32
    %c0_i32_0 = arith.constant 0 : i32
    %c0_i32_1 = arith.constant 0 : i32
    %c0_i32_2 = arith.constant 0 : i32
    return %c0_i32, %c0_i32_0, %c0_i32_1 : i32, i32, i32
  }
  func.func @transform_2(%arg0: i32) -> (i32, i32, i32) {
    %c0_i32 = arith.constant 0 : i32
    %c0_i32_0 = arith.constant 0 : i32
    %c0_i32_1 = arith.constant 0 : i32
    %c0_i32_2 = arith.constant 0 : i32
    return %c0_i32, %c0_i32_0, %c0_i32_1 : i32, i32, i32
  }
  func.func @transform_3(%arg0: i32) -> (i32, i32, i32) {
    %c0_i32 = arith.constant 0 : i32
    %c0_i32_0 = arith.constant 0 : i32
    %c0_i32_1 = arith.constant 0 : i32
    return %arg0, %c0_i32, %c0_i32_0 : i32, i32, i32
  }
}

</mosaic_0001>

<bundles_post_ra>
// kernel: tpu_custom_call.1
= control target key start
LH: loop header
LB: loop body
LE: loop exit
PB: predicated region body
PF: predicated region fallthrough
CT: control target
= control target key end

     0   :  { %8 = vsyncpa [#allocation4], 0  ;;  %s1795_s0 = inlined_call_operand.hbm [shape: f32[2,32,160], index: 0, kind: input, shape index: {}]   ;;  %s1796_s1 = inlined_call_operand.hbm [shape: f32[6,160,160], index: 1, kind: input, shape index: {}]   ;;  %s1797_s2 = inlined_call_operand.hbm [shape: f32[2,1,160], index: 2, kind: input, shape index: {}]   ;;  %s1798_s3 = inlined_call_operand.hbm [shape: f32[2,16,128], index: 3, kind: output, shape index: {}]  }
   0x1   :  { %10 = vsyncpa [#allocation4 + $0x1], 0 }
   0x2   :  { %11 = vsyncpa [#allocation7], 0 }
   0x3   :  { %12 = vsyncpa [#allocation5], 0 }
   0x4   :  { %14 = vsyncpa [#allocation5 + $0x1], 0  ;;  %s1505_s12 = smov 0   ;;  %s1507_s13 = smov 0  }
   0x5   :  { %s1509_s14 = smov 0   ;;  %s1511_s15 = smov 0  }
   0x6 LB: > { %s1526_s16 = sadd.s32 4294967295, %s1473_s15   ;;  %s1220_s17 = sadd.s32 4294967294, %s1473_s15   ;;  %s1473_s15 = sphi %s1511_s15, %s1819_s15   ;;  %s1469_s14 = sphi %s1509_s14, %s1818_s14   ;;  %s1465_s13 = sphi %s1507_s13, %s1817_s13   ;;  %s1461_s12 = sphi %s1505_s12, %s1816_s12  }
   0x7   : > { %p40_p0 = scmp.ne.s32.totalorder %s1465_s13, %s1461_s12  ;;  %p1799_p1 = scmp.eq.s32.totalorder %s1526_s16, 0 }
   0x8   : > { %p106_p2 = scmp.eq.s32.totalorder %s1526_s16, 1  ;;  %p112_p3 = scmp.eq.s32.totalorder %s1220_s17, 1 }
   0x9   : > { %p1535_p4 = por %p1799_p1, %p40_p0  ;;  %p1221_p5 = scmp.ge.s32.totalorder %s1473_s15, 1 }
   0xa   : > { %p1540_p6 = por %p112_p3, %p40_p0  ;;  %p119_p7 = scmp.lt.s32.totalorder %s1473_s15, 3 }
   0xb   : > { %s1803_s18 = scalar_select %p1535_p4, 1, 0 }
   0xc   : > { %s1804_s19 = scalar_select %p1540_p6, 1, 0 }
   0xd   : > { %p1545_p8 = pnand %p1221_p5, %p119_p7  ;;  %s1475_s21 = smov [#allocation6]  }
   0xe   : > { %s131_s22 = sshll.u32 %s1475_s21, 4  ;;  %s1476_s24 = smov [#allocation8]   ;;  %s132_s22 = int_to_ptr.vmem [resolvable:$true] %s131_s22 }
   0xf   : > { %s1805_s20 = scalar_select %p1545_p8, 1, 0 }
  0x10   : > { %p1264_p9 = pneg %p1545_p8  ;;  %s144_s25 = sshll.u32 %s1476_s24, 4  ;;  %s145_s25 = int_to_ptr.vmem [resolvable:$true] %s144_s25 }
  0x11   : > { %s1336_s26 = scalar_lea.vmem %s132_s22, 30720  ;;  %p1344_p5 = scmp.lt.s32.totalorder %s132_s22, %s132_s22 }
  0x12   : > { %p1554_p11 = pnand %p1264_p9, %p1799_p1  ;;  %p1337_p13 = scmp.ne.s32.totalorder %s132_s22, %s1336_s26 }
  0x13   : > { %p1345_p7 = scmp.lt.s32.totalorder %s1336_s26, %s1336_s26 }
  0x14   : > { %p1327_p12 = pneg %p1554_p11 }
  0x15   : > { %p1346_p10 = por %p1345_p7, %p1344_p5 }
  0x16   : > { %p1339_p0 = pnand %p1337_p13, %p1327_p12 }
  0x18   : > { %p1340_p3 = pneg %p1339_p0 }
  0x1a   : > { %p1347_p9 = pnand %p1346_p10, %p1340_p3 }
  0x1c   : > { %1350 = shalt.err (!%p1347_p9)
}
  0x1d   : > { %s1477_s27 = smov 256   ;;  %s1478_s28 = smov 16  }
  0x1e   : > { %1267 = dma.hbm_to_vmem [thread:$0]  (!%p1554_p11), %s1796_s1, 30720, %s132_s22, [#allocation7], %s1477_s27, %s1477_s27, %s1478_s28  }
  0x1f   : > { %s1362_s4 = scalar_lea.vmem %s145_s25, 64  ;;  %p1370_p10 = scmp.lt.s32.totalorder %s145_s25, %s145_s25 }
  0x20   : > { %p1363_p13 = scmp.ne.s32.totalorder %s145_s25, %s1362_s4  ;;  %p1371_p3 = scmp.lt.s32.totalorder %s1362_s4, %s1362_s4 }
  0x22   : > { %p1365_p0 = pnand %p1363_p13, %p1327_p12  ;;  %p1372_p7 = por %p1371_p3, %p1370_p10 }
  0x24   : > { %p1366_p5 = pneg %p1365_p0 }
  0x26   : > { %p1373_p9 = pnand %p1372_p7, %p1366_p5 }
  0x28   : > { %1376 = shalt.err (!%p1373_p9)
}
  0x29   : > { %s1479_s5 = smov 32   ;;  %s1480_s6 = smov 2  }
  0x2a   : > { %1270 = dma.hbm_to_vmem [thread:$0]  (!%p1554_p11), %s1797_s2, 64, %s145_s25, [#allocation7], %s1479_s5, %s1479_s5, %s1480_s6  }
  0x2b   : > { %s1580_s9 = sadd.s32 1, %s1473_s15   ;;  %s27_s11 = sadd.s32 1, %s1469_s14 }
  0x2c   : > { %s24_s10 = ssub.s32 %s1473_s15, %s1580_s9  ;;  %p34_p13 = scmp.ne.s32.totalorder %s1469_s14, %s1465_s13 }
  0x2d   : > { %p25_p12 = scmp.eq.s32.totalorder %s24_s10, 0  ;;  %p35_p0 = scmp.eq.s32.totalorder %s1473_s15, 0 }
  0x2e   : > { %p1593_p10 = por %p106_p2, %p34_p13  ;;  %p1281_p3 = scmp.lt.s32.totalorder %s1473_s15, 2 }
  0x2f   : > { %s1589_s17 = scalar_select %p25_p12, %s1469_s14, %s27_s11  }
  0x30   : > { %p36_p5 = por %p35_p0, %p34_p13  ;;  %s158_s22 = sand.u32 1, %s1469_s14  }
  0x31   : > { %s1807_s21 = scalar_select %p1593_p10, 1, 0 }
  0x32   : > { %s1225_s23 = sshll.u32 %s158_s22, 6  ;;  %s1250_s24 = sshll.u32 %s1473_s15, 10 }
  0x33   : > { %s1603_s29 = scalar_lea.hbm %s1795_s0, %s1250_s24  ;;  %s162_s30 = scalar_lea.vmem [#allocation3], %s1225_s23 }
  0x34   : > { %s169_s4 = sshll.u32 %s162_s30, 4  ;;  %p1607_p2 = pnand %p1281_p3, %p36_p5  ;;  %s1605_s4 = int_to_ptr.vmem [resolvable:$true] %s169_s4 }
  0x35   : > { %s1611_s6 = scalar_lea.sflag [#allocation4], %s158_s22  ;;  %s1377_s7 = scalar_lea.hbm %s1603_s29, 1024 }
  0x36   : > { %p1378_p11 = scmp.ne.s32.totalorder %s1603_s29, %s1377_s7  ;;  %p1379_p7 = pneg %p1607_p2 }
  0x37   : > { %s1382_s11 = scalar_lea.hbm %s1795_s0, 2048  ;;  %p1383_p13 = scmp.lt.s32.totalorder %s1603_s29, %s1795_s0 }
  0x38   : > { %p1380_p9 = pnand %p1379_p7, %p1378_p11  ;;  %p1384_p0 = scmp.lt.s32.totalorder %s1382_s11, %s1377_s7 }
  0x3a   : > { %p1381_p12 = pneg %p1380_p9  ;;  %p1385_p5 = por %p1384_p0, %p1383_p13 }
  0x3c   : > { %p1386_p3 = pnand %p1385_p5, %p1381_p12 }
  0x3e   : > { %1389 = shalt.err (!%p1386_p3)
}
  0x3f   : > { %s1390_s22 = scalar_lea.vmem %s1605_s4, 1024  ;;  %s1481_s25 = smov [#allocation3]  }
  0x40   : > { %p1391_p1 = scmp.ne.s32.totalorder %s1605_s4, %s1390_s22  ;;  %s1395_s26 = sshll.u32 %s1481_s25, 4  ;;  %s1396_s26 = int_to_ptr.vmem [resolvable:$false] %s1395_s26 }
  0x41   : > { %s1397_s30 = scalar_lea.vmem %s1396_s26, 2048  ;;  %p1398_p9 = scmp.lt.s32.totalorder %s1605_s4, %s1396_s26 }
  0x42   : > { %p1393_p6 = pnand %p1391_p1, %p1379_p7  ;;  %p1399_p10 = scmp.lt.s32.totalorder %s1397_s30, %s1390_s22 }
  0x44   : > { %p1394_p11 = pneg %p1393_p6  ;;  %p1400_p4 = por %p1399_p10, %p1398_p9 }
  0x46   : > { %p1401_p8 = pnand %p1400_p4, %p1394_p11 }
  0x48   : > { %1404 = shalt.err (!%p1401_p8)
}
  0x49   : > { %1274 = dma.hbm_to_vmem [thread:$0]  (!%p1607_p2), %s1603_s29, 1024, %s1605_s4, %s1611_s6, %s1477_s27, %s1477_s27, %s1478_s28  }
  0x4a   : > { %p1809_p1 = scmp.ne.s32.totalorder %s1805_s20, 0 }
  0x4b   : > { %s1638_s7 = sand.u32 (!%p1809_p1), 1, %s1465_s13   ;;  %p1810_p4 = scmp.ne.s32.totalorder (!%p1809_p1), %s1803_s18, 0 }
  0x4c   : > { %181 = sbr.rel (%p1809_p1) target bundleno = 634 (0x27a), region = 32  ;;  %s1229_s8 = sshll.u32 (!%p1809_p1), %s1638_s7, 6 }
  0x4d   : > { %s184_s10 = scalar_lea.sflag (!%p1809_p1), [#allocation4], %s1638_s7  ;;  %s1642_s11 = scalar_lea.vmem (!%p1809_p1), [#allocation3], %s1229_s8 }
  0x51   : > { %1448 = dma.done.wait (%p1810_p4), %s184_s10, 1024  }
  0x52   : > { %1450 = vsyncadd (%p1810_p4), %s184_s10, 4294966272  ;;  %p1811_p6 = scmp.eq.s32.totalorder %s1526_s16, 0 }
  0x54   : > { %1452 = dma.done.wait (%p1811_p6), [#allocation7], 30784   ;;  %p1812_p8 = pmov %p1811_p6 }
  0x55   : > { %v284_v0 = vld [vmem:[#allocation6 + $0xf8] sm:$0xff]  ;;  %v283_v1 = vld [vmem:[#allocation6 + $0xf0] sm:$0xff]  ;;  %v282_v2 = vld [vmem:[#allocation6 + $0xe8] sm:$0xff]  ;;  %vm227_vm0 = vcmask 261120   ;;  %vm299_vm1 = vcmask 1041408   ;;  %vm579_vm2 = vcmask 1045504  }
  0x56   : > { %1454 = vsyncadd (%p1812_p8), [#allocation7], 4294936512  ;;  %316 = vmatprep.subr.mxu0 %v284_v0  ;;  %v431_v3 = vld [vmem:[#allocation6 + $0x238] sm:$0xff]  ;;  %v281_v4 = vld [vmem:[#allocation6 + $0xe0] sm:$0xff]  ;;  %s1232_s18 = sshll.u32 %s1638_s7, 4  ;;  %s1251_s28 = sshll.u32 %s1526_s16, 8 }
  0x57   : > { %v430_v5 = vld [vmem:[#allocation6 + $0x230] sm:$0xff]  ;;  %317 = vmatpush1.msra.mxu0 %v283_v1  ;;  %445 = vmatprep.subr.mxu1 %v431_v3  ;;  %v280_v6 = vld [vmem:[#allocation6 + $0xd8] sm:$0xff]  ;;  %v429_v7 = vld [vmem:[#allocation6 + $0x228] sm:$0xff]  ;;  %s217_s20 = scalar_lea.vmem [#allocation9], %s1232_s18  ;;  %s1752_s5 = scalar_lea.hbm %s1798_s3, %s1251_s28 }
  0x58   : > { %318 = vmatprep.subr.mxu0 %v282_v2  ;;  %446 = vmatpush1.msra.mxu1 %v430_v5  ;;  %v279_v8 = vld [vmem:[#allocation6 + $0xd0] sm:$0xff]  ;;  %v428_v9 = vld [vmem:[#allocation6 + $0x220] sm:$0xff]  ;;  %v427_v10 = vld [vmem:[#allocation6 + $0x218] sm:$0xff]  ;;  %s1128_s27 = sshll.u32 %s217_s20, 4  ;;  %s1115_s6 = scalar_lea.sflag [#allocation5], %s1638_s7  ;;  %s1747_s27 = int_to_ptr.vmem [resolvable:$true] %s1128_s27 }
  0x59   : > { %319 = vmatpush1.msra.mxu0 %v281_v4  ;;  %447 = vmatprep.subr.mxu1 %v429_v7  ;;  %v278_v11 = vld [vmem:[#allocation6 + $0xc8] sm:$0xff]  ;;  %v426_v12 = vld [vmem:[#allocation6 + $0x210] sm:$0xff]  ;;  %v277_v13 = vld [vmem:[#allocation6 + $0xc0] sm:$0xff]  ;;  %s1405_s23 = scalar_lea.vmem %s1747_s27, 256  ;;  %p1813_p2 = scmp.ne.s32.totalorder %s1807_s21, 0 }
  0x5a   : > { %320 = vmatprep.subr.mxu0 %v280_v6  ;;  %448 = vmatpush1.msra.mxu1 %v428_v9  ;;  %v425_v14 = vld [vmem:[#allocation6 + $0x208] sm:$0xff]  ;;  %v276_v15 = vld [vmem:[#allocation6 + $0xb8] sm:$0xff]  ;;  %v424_v16 = vld [vmem:[#allocation6 + $0x200] sm:$0xff]  ;;  %p1406_p10 = scmp.ne.s32.totalorder %s1747_s27, %s1405_s23  ;;  %s1482_s16 = smov [#allocation9]  }
  0x5b   : > { %321 = vmatpush1.msra.mxu0 %v279_v8  ;;  %449 = vmatprep.subr.mxu1 %v427_v10  ;;  %v275_v17 = vld [vmem:[#allocation6 + $0xb0] sm:$0xff]  ;;  %v423_v18 = vld [vmem:[#allocation6 + $0x1f8] sm:$0xff]  ;;  %v274_v19 = vld [vmem:[#allocation6 + $0xa8] sm:$0xff]  ;;  %s1409_s24 = sshll.u32 %s1482_s16, 4  ;;  %s1410_s24 = int_to_ptr.vmem [resolvable:$false] %s1409_s24 }
  0x5c   : > { %322 = vmatprep.subr.mxu0 %v278_v11  ;;  %450 = vmatpush1.msra.mxu1 %v426_v12  ;;  %v422_v20 = vld [vmem:[#allocation6 + $0x1f0] sm:$0xff]  ;;  %v273_v21 = vld [vmem:[#allocation6 + $0xa0] sm:$0xff]  ;;  %v421_v22 = vld [vmem:[#allocation6 + $0x1e8] sm:$0xff]  ;;  %p1407_p7 = pnand %p1406_p10, %p1813_p2  ;;  %s1411_s22 = scalar_lea.vmem %s1410_s24, 512 }
  0x5d   : > { %323 = vmatpush1.msra.mxu0 %v277_v13  ;;  %451 = vmatprep.subr.mxu1 %v425_v14  ;;  %v272_v23 = vld [vmem:[#allocation6 + $0x98] sm:$0xff]  ;;  %v420_v24 = vld [vmem:[#allocation6 + $0x1e0] sm:$0xff]  ;;  %v271_v25 = vld [vmem:[#allocation6 + $0x90] sm:$0xff]  ;;  %p1412_p13 = scmp.lt.s32.totalorder %s1747_s27, %s1410_s24  ;;  %p1413_p0 = scmp.lt.s32.totalorder %s1411_s22, %s1405_s23 }
  0x5e   : > { %324 = vmatprep.subr.mxu0 %v276_v15  ;;  %452 = vmatpush1.msra.mxu1 %v424_v16  ;;  %v419_v26 = vld [vmem:[#allocation6 + $0x1d8] sm:$0xff]  ;;  %v270_v27 = vld [vmem:[#allocation6 + $0x88] sm:$0xff]  ;;  %v418_v28 = vld [vmem:[#allocation6 + $0x1d0] sm:$0xff]  ;;  %p1408_p12 = pneg %p1407_p7 }
  0x5f   : > { %325 = vmatpush1.msra.mxu0 %v275_v17  ;;  %453 = vmatprep.subr.mxu1 %v423_v18  ;;  %v269_v29 = vld [vmem:[#allocation6 + $0x80] sm:$0xff]  ;;  %v417_v30 = vld [vmem:[#allocation6 + $0x1c8] sm:$0xff]  ;;  %v268_v31 = vld [vmem:[#allocation6 + $0x78] sm:$0xff]  ;;  %p1414_p5 = por %p1413_p0, %p1412_p13 }
  0x60   : > { %326 = vmatprep.subr.mxu0 %v274_v19  ;;  %454 = vmatpush1.msra.mxu1 %v422_v20  ;;  %v416_v32 = vld [vmem:[#allocation6 + $0x1c0] sm:$0xff]  ;;  %v267_v33 = vld [vmem:[#allocation6 + $0x70] sm:$0xff]  ;;  %v415_v34 = vld [vmem:[#allocation6 + $0x1b8] sm:$0xff] }
  0x61   : > { %327 = vmatpush1.msra.mxu0 %v273_v21  ;;  %455 = vmatprep.subr.mxu1 %v421_v22  ;;  %v266_v35 = vld [vmem:[#allocation6 + $0x68] sm:$0xff]  ;;  %v414_v36 = vld [vmem:[#allocation6 + $0x1b0] sm:$0xff]  ;;  %v265_v37 = vld [vmem:[#allocation6 + $0x60] sm:$0xff]  ;;  %p1415_p3 = pnand %p1414_p5, %p1408_p12 }
  0x62   : > { %328 = vmatprep.subr.mxu0 %v272_v23  ;;  %456 = vmatpush1.msra.mxu1 %v420_v24  ;;  %v413_v38 = vld [vmem:[#allocation6 + $0x1a8] sm:$0xff]  ;;  %v264_v39 = vld [vmem:[#allocation6 + $0x58] sm:$0xff]  ;;  %v412_v40 = vld [vmem:[#allocation6 + $0x1a0] sm:$0xff] }
  0x63   : > { %329 = vmatpush1.msra.mxu0 %v271_v25  ;;  %457 = vmatprep.subr.mxu1 %v419_v26  ;;  %v263_v41 = vld [vmem:[#allocation6 + $0x50] sm:$0xff]  ;;  %v411_v42 = vld [vmem:[#allocation6 + $0x198] sm:$0xff]  ;;  %v262_v43 = vld [vmem:[#allocation6 + $0x48] sm:$0xff] }
  0x64   : > { %330 = vmatprep.subr.mxu0 %v270_v27  ;;  %458 = vmatpush1.msra.mxu1 %v418_v28  ;;  %v410_v44 = vld [vmem:[#allocation6 + $0x190] sm:$0xff]  ;;  %v261_v45 = vld [vmem:[#allocation6 + $0x40] sm:$0xff]  ;;  %v409_v46 = vld [vmem:[#allocation6 + $0x188] sm:$0xff] }
  0x65   : > { %331 = vmatpush1.msra.mxu0 %v269_v29  ;;  %459 = vmatprep.subr.mxu1 %v417_v30  ;;  %v260_v47 = vld [vmem:[#allocation6 + $0x38] sm:$0xff]  ;;  %v408_v48 = vld [vmem:[#allocation6 + $0x180] sm:$0xff]  ;;  %v259_v49 = vld [vmem:[#allocation6 + $0x30] sm:$0xff] }
  0x66   : > { %332 = vmatprep.subr.mxu0 %v268_v31  ;;  %460 = vmatpush1.msra.mxu1 %v416_v32  ;;  %v407_v50 = vld [vmem:[#allocation6 + $0x178] sm:$0xff]  ;;  %v258_v51 = vld [vmem:[#allocation6 + $0x28] sm:$0xff]  ;;  %v257_v52 = vld [vmem:[#allocation6 + $0x20] sm:$0xff] }
  0x67   : > { %333 = vmatpush1.msra.mxu0 %v267_v33  ;;  %461 = vmatprep.subr.mxu1 %v415_v34  ;;  %v406_v53 = vld [vmem:[#allocation6 + $0x170] sm:$0xff]  ;;  %v256_v54 = vld [vmem:[#allocation6 + $0x18] sm:$0xff]  ;;  %v405_v55 = vld [vmem:[#allocation6 + $0x168] sm:$0xff] }
  0x68   : > { %334 = vmatprep.subr.mxu0 %v266_v35  ;;  %462 = vmatpush1.msra.mxu1 %v414_v36  ;;  %v219_v56 = vld [vmem:[%s1642_s11 + $0x8] sm:$0xff]  ;;  %v404_v57 = vld [vmem:[#allocation6 + $0x160] sm:$0xff]  ;;  %v221_v58 = vld [vmem:[%s1642_s11 + $0x18] sm:$0xff] }
  0x69   : > { %335 = vmatpush1.msra.mxu0 %v265_v37  ;;  %463 = vmatprep.subr.mxu1 %v413_v38  ;;  %228 = vst.msk [vmem:[#allocation2 + $0x8] sm:$0xff] %vm227_vm0, %v219_v56  ;;  %v218_v59 = vld [vmem:[%s1642_s11] sm:$0xff]  ;;  %v255_v60 = vld [vmem:[#allocation6 + $0x10] sm:$0xff]  ;;  %v403_v61 = vld [vmem:[#allocation6 + $0x158] sm:$0xff] }
  0x6a   : > { %336 = vmatprep.subr.mxu0 %v264_v39  ;;  %464 = vmatpush1.msra.mxu1 %v412_v40  ;;  %230 = vst.msk [vmem:[#allocation2 + $0x18] sm:$0xff] %vm227_vm0, %v221_v58  ;;  %v1658_v62 = vld [vmem:[%s1642_s11 + $0x10] sm:$0xff]  ;;  %226 = vst [vmem:[#allocation2] sm:$0xff] %v218_v59  ;;  %v254_v63 = vld [vmem:[#allocation6 + $0x8] sm:$0xff] }
  0x6b   : > { %337 = vmatpush1.msra.mxu0 %v263_v41  ;;  %465 = vmatprep.subr.mxu1 %v411_v42  ;;  %v402_v0 = vld [vmem:[#allocation6 + $0x150] sm:$0xff]  ;;  %229 = vst [vmem:[#allocation2 + $0x10] sm:$0xff] %v1658_v62  ;;  %v253_v1 = vld [vmem:[#allocation6] sm:$0xff]  ;;  %v401_v2 = vld [vmem:[#allocation6 + $0x148] sm:$0xff]  ;;  %v301_v17 = vrot.slane %v1658_v62, 6 }
  0x6c   : > { %338 = vmatprep.subr.mxu0 %v262_v43  ;;  %466 = vmatpush1.msra.mxu1 %v410_v44  ;;  %v292_v3 = vld [vmem:[#allocation6 + $0x138] sm:$0xff]  ;;  %v400_v4 = vld [vmem:[#allocation6 + $0x140] sm:$0xff]  ;;  %v291_v5 = vld [vmem:[#allocation6 + $0x130] sm:$0xff] }
  0x6d   : > { %339 = vmatpush1.msra.mxu0 %v261_v45  ;;  %467 = vmatprep.subr.mxu1 %v409_v46  ;;  %v439_v6 = vld [vmem:[#allocation6 + $0x278] sm:$0xff]  ;;  %v290_v7 = vld [vmem:[#allocation6 + $0x128] sm:$0xff]  ;;  %v289_v8 = vld [vmem:[#allocation6 + $0x120] sm:$0xff] }
  0x6e   : > { %340 = vmatprep.subr.mxu0 %v260_v47  ;;  %468 = vmatpush1.msra.mxu1 %v408_v48  ;;  %v438_v9 = vld [vmem:[#allocation6 + $0x270] sm:$0xff]  ;;  %v288_v10 = vld [vmem:[#allocation6 + $0x118] sm:$0xff]  ;;  %v437_v11 = vld [vmem:[#allocation6 + $0x268] sm:$0xff] }
  0x6f   : > { %341 = vmatpush1.msra.mxu0 %v259_v49  ;;  %469 = vmatprep.subr.mxu1 %v407_v50  ;;  %v436_v13 = vld [vmem:[#allocation6 + $0x260] sm:$0xff]  ;;  %v287_v18 = vld [vmem:[#allocation6 + $0x110] sm:$0xff]  ;;  %v435_v19 = vld [vmem:[#allocation6 + $0x258] sm:$0xff] }
  0x70   : > { %342 = vmatprep.subr.mxu0 %v258_v51  ;;  %470 = vmatpush1.msra.mxu1 %v406_v53  ;;  %v248_v12 = vld [vmem:[#allocation2 + $0x8] sm:$0xc0]  ;;  %v285_v23 = vld [vmem:[#allocation6 + $0x100] sm:$0xff]  ;;  %v434_v25 = vld [vmem:[#allocation6 + $0x250] sm:$0xff] }
  0x71   : > { %343 = vmatpush1.msra.mxu0 %v257_v52  ;;  %471 = vmatprep.subr.mxu1 %v405_v55  ;;  %v1661_v14 = vld [vmem:[#allocation2 + $0x18] sm:$0xff]  ;;  %v303_v15 = vrot.slane %v248_v12, 6  ;;  %v247_v16 = vld [vmem:[#allocation2] sm:$0xc0]  ;;  %v286_v22 = vld [vmem:[#allocation6 + $0x108] sm:$0xff] }
  0x72   : > { %344 = vmatprep.subr.mxu0 %v256_v54  ;;  %472 = vmatpush1.msra.mxu1 %v404_v57  ;;  %v304_v20 = vrot.slane %v1661_v14, 6  ;;  %v300_v21 = vrot.slane %v247_v16, 6  ;;  %v433_v27 = vld [vmem:[#allocation6 + $0x248] sm:$0xff]  ;;  %v564_v28 = vld [vmem:[#allocation6 + $0x378] sm:$0xff]  ;;  %v432_v29 = vld [vmem:[#allocation6 + $0x240] sm:$0xff] }
  0x73   : > { %345 = vmatpush1.msra.mxu0 %v255_v60  ;;  %473 = vmatprep.subr.mxu1 %v403_v61  ;;  %v563_v30 = vld [vmem:[#allocation6 + $0x370] sm:$0xff]  ;;  %v223_v31 = vld [vmem:[%s1642_s11 + $0x28] sm:$0xff]  ;;  %v1674_v32 = vld [vmem:[%s1642_s11 + $0x20] sm:$0xff] }
  0x74   : > { %346 = vmatprep.subr.mxu0 %v254_v63  ;;  %474 = vmatpush1.msra.mxu1 %v402_v0  ;;  %v305_v24 = vsel %vm299_vm1, %v303_v15, %v304_v20  ;;  %v302_v26 = vsel %vm299_vm1, %v300_v21, %v301_v17  ;;  %v562_v33 = vld [vmem:[#allocation6 + $0x368] sm:$0xff]  ;;  %232 = vst.msk [vmem:[#allocation2 + $0x28] sm:$0xff] %vm227_vm0, %v223_v31  ;;  %231 = vst [vmem:[#allocation2 + $0x20] sm:$0xff] %v1674_v32  ;;  %v561_v34 = vld [vmem:[#allocation6 + $0x360] sm:$0xff] }
  0x75   : > { %347 = vmatpush1.msra.mxu0 %v253_v1  ;;  %475 = vmatprep.subr.mxu1 %v401_v2  ;;  %v560_v35 = vld [vmem:[#allocation6 + $0x358] sm:$0xff]  ;;  %v559_v37 = vld [vmem:[#allocation6 + $0x350] sm:$0xff]  ;;  %v558_v39 = vld [vmem:[#allocation6 + $0x348] sm:$0xff] }
  0x76   : > { %372 = vmatprep.subr.mxu0 %v292_v3  ;;  %476 = vmatpush1.msra.mxu1 %v400_v4  ;;  %v225_v36 = vld [vmem:[%s1642_s11 + $0x38] sm:$0xff]  ;;  %v224_v38 = vld [vmem:[%s1642_s11 + $0x30] sm:$0xff]  ;;  %v557_v41 = vld [vmem:[#allocation6 + $0x340] sm:$0xff] }
  0x77   : > { %373 = vmatpush2.msra.mxu0 %v291_v5  ;;  %501 = vmatprep.subr.mxu1 %v439_v6  ;;  %234 = vst.msk [vmem:[#allocation2 + $0x38] sm:$0xff] %vm227_vm0, %v225_v36  ;;  %v527_v40 = vld [vmem:[#allocation2 + $0x18] sm:$0xfc]  ;;  %233 = vst [vmem:[#allocation2 + $0x30] sm:$0xff] %v224_v38  ;;  %v555_v43 = vld [vmem:[#allocation6 + $0x330] sm:$0xff] }
  0x78   : > { %374 = vmatprep.subr.mxu0 %v290_v7  ;;  %502 = vmatpush2.msra.mxu1 %v438_v9  ;;  %v556_v42 = vld [vmem:[#allocation6 + $0x338] sm:$0xff]  ;;  %v583_v47 = vrot.slane %v527_v40, 2  ;;  %v554_v48 = vld [vmem:[#allocation6 + $0x328] sm:$0xff]  ;;  %v553_v52 = vld [vmem:[#allocation6 + $0x320] sm:$0xff] }
  0x79   : > { %375 = vmatpush2.msra.mxu0 %v289_v8  ;;  %503 = vmatprep.subr.mxu1 %v437_v11  ;;  %v552_v53 = vld [vmem:[#allocation6 + $0x318] sm:$0xff]  ;;  %v551_v56 = vld [vmem:[#allocation6 + $0x310] sm:$0xff]  ;;  %v550_v58 = vld [vmem:[#allocation6 + $0x308] sm:$0xff] }
  0x7a   : > { %376 = vmatprep.subr.mxu0 %v288_v10  ;;  %504 = vmatpush2.msra.mxu1 %v436_v13  ;;  %v549_v59 = vld [vmem:[#allocation6 + $0x300] sm:$0xff]  ;;  %v548_v60 = vld [vmem:[#allocation6 + $0x2f8] sm:$0xff]  ;;  %v547_v61 = vld [vmem:[#allocation6 + $0x2f0] sm:$0xff] }
  0x7b   : > { %377 = vmatpush2.msra.mxu0 %v287_v18  ;;  %505 = vmatprep.subr.mxu1 %v435_v19  ;;  %v252_v44 = vld [vmem:[#allocation2 + $0x28] sm:$0x3f]  ;;  %v251_v45 = vld [vmem:[#allocation2 + $0x20] sm:$0x3f]  ;;  %v544_v0 = vld [vmem:[#allocation6 + $0x2d8] sm:$0xff] }
  0x7c   : > { %378 = vmatprep.subr.mxu0 %v286_v22  ;;  %1233 = vmatprep.mubr.msk.f32.mxu0 %vm227_vm0, %v305_v24  ;;  %v1684_v46 = vld [vmem:[#allocation2 + $0x28] sm:$0xff]  ;;  %v308_v49 = vrot.slane %v252_v44, 6  ;;  %v306_v50 = vrot.slane %v251_v45, 6  ;;  %v545_v63 = vld [vmem:[#allocation6 + $0x2e0] sm:$0xff]  ;;  %v543_v1 = vld [vmem:[#allocation6 + $0x2d0] sm:$0xff] }
  0x7d   : > { %379 = vmatpush2.msra.mxu0 %v285_v23  ;;  %506 = vmatpush2.msra.mxu1 %v434_v25  ;;  %v584_v51 = vrot.slane %v1684_v46, 2  ;;  %v542_v2 = vld [vmem:[#allocation6 + $0x2c8] sm:$0xff]  ;;  %v541_v3 = vld [vmem:[#allocation6 + $0x2c0] sm:$0xff]  ;;  %v540_v4 = vld [vmem:[#allocation6 + $0x2b8] sm:$0xff] }
  0x7e   : > { %381 = vmatmul.mubr.f32.vlgmr.msra.gmra.mxu0 %v302_v26  ;;  %507 = vmatprep.subr.mxu1 %v433_v27  ;;  %v309_v54 = vsel %vm299_vm1, %v304_v20, %v308_v49  ;;  %v307_v55 = vsel %vm299_vm1, %v301_v17, %v306_v50  ;;  %v539_v5 = vld [vmem:[#allocation6 + $0x2b0] sm:$0xff]  ;;  %v538_v6 = vld [vmem:[#allocation6 + $0x2a8] sm:$0xff]  ;;  %v537_v7 = vld [vmem:[#allocation6 + $0x2a0] sm:$0xff]  ;;  %v581_v20 = vrot.slane %v1674_v32, 2 }
  0x7f   : > { %596 = vmatprep.subr.mxu0 %v564_v28  ;;  %508 = vmatpush2.msra.mxu1 %v432_v29  ;;  %v585_v57 = vsel %vm579_vm2, %v583_v47, %v584_v51  ;;  %v536_v8 = vld [vmem:[#allocation6 + $0x298] sm:$0xff]  ;;  %v535_v9 = vld [vmem:[#allocation6 + $0x290] sm:$0xff]  ;;  %v534_v10 = vld [vmem:[#allocation6 + $0x288] sm:$0xff] }
  0x80   : > { %1235 = vmatprep.mubr.msk.f32.mxu1 %vm227_vm0, %v1661_v14  ;;  %597 = vmatpush1.msra.mxu0 %v563_v30  ;;  %v533_v11 = vld [vmem:[#allocation6 + $0x280] sm:$0xff]  ;;  %v572_v12 = vld [vmem:[#allocation6 + $0x3b8] sm:$0xff]  ;;  %v571_v13 = vld [vmem:[#allocation6 + $0x3b0] sm:$0xff] }
  0x81   : > { %510 = vmatmul.mubr.f32.vlgmr.msra.gmra.mxu1 %v1658_v62  ;;  %598 = vmatprep.subr.mxu0 %v562_v33  ;;  %v546_v62 = vld [vmem:[#allocation6 + $0x2e8] sm:$0xff]  ;;  %v526_v14 = vld [vmem:[#allocation2 + $0x10] sm:$0xfc]  ;;  %v531_v16 = vld [vmem:[#allocation2 + $0x38] sm:$0x3] }
  0x82   : > { %599 = vmatpush1.msra.mxu0 %v561_v34  ;;  %1236 = vmatprep.mubr.msk.f32.mxu1 %vm227_vm0, %v1684_v46  ;;  %v570_v15 = vld [vmem:[#allocation6 + $0x3a8] sm:$0xff]  ;;  %v569_v17 = vld [vmem:[#allocation6 + $0x3a0] sm:$0xff]  ;;  %v568_v18 = vld [vmem:[#allocation6 + $0x398] sm:$0xff]  ;;  %v580_v19 = vrot.slane %v526_v14, 2  ;;  %v588_v22 = vrot.slane %v531_v16, 2 }
  0x83   : > { %600 = vmatprep.subr.mxu0 %v560_v35  ;;  %1234 = vmatprep.mubr.msk.f32.mxu0 %vm227_vm0, %v309_v54  ;;  %v567_v21 = vld [vmem:[#allocation6 + $0x390] sm:$0xff]  ;;  %v566_v24 = vld [vmem:[#allocation6 + $0x388] sm:$0xff]  ;;  %v565_v25 = vld [vmem:[#allocation6 + $0x380] sm:$0xff] }
  0x84   : > { %601 = vmatpush1.msra.mxu0 %v559_v37  ;;  %v530_v23 = vld [vmem:[#allocation2 + $0x30] sm:$0x3]  ;;  %v582_v26 = vsel %vm579_vm2, %v580_v19, %v581_v20  ;;  %v589_v28 = vsel %vm579_vm2, %v584_v51, %v588_v22  ;;  %v873_v30 = vld [vmem:[#allocation6 + $0x5f8] sm:$0xff]  ;;  %v871_v33 = vld [vmem:[#allocation6 + $0x5e8] sm:$0xff] }
  0x85   : > { %602 = vmatprep.subr.mxu0 %v558_v39  ;;  %516 = vmatmul.mubr.f32.gmra.mxu1 %v1674_v32  ;;  %v586_v27 = vrot.slane %v530_v23, 2  ;;  %v872_v31 = vld [vmem:[#allocation6 + $0x5f0] sm:$0xff]  ;;  %v731_v32 = vld [vmem:[#allocation6 + $0x4b8] sm:$0xff]  ;;  %v870_v35 = vld [vmem:[#allocation6 + $0x5e0] sm:$0xff] }
  0x86   : > { %603 = vmatpush1.msra.mxu0 %v557_v41  ;;  %762 = vmatprep.subr.mxu1 %v731_v32  ;;  %v730_v34 = vld [vmem:[#allocation6 + $0x4b0] sm:$0xff]  ;;  %v729_v36 = vld [vmem:[#allocation6 + $0x4a8] sm:$0xff]  ;;  %v869_v37 = vld [vmem:[#allocation6 + $0x5d8] sm:$0xff] }
  0x87   : > { %604 = vmatprep.subr.mxu0 %v556_v42  ;;  %387 = vmatmul.mubr.f32.gmra.mxu0 %v307_v55  ;;  %v587_v29 = vsel %vm579_vm2, %v581_v20, %v586_v27  ;;  %v728_v38 = vld [vmem:[#allocation6 + $0x4a0] sm:$0xff]  ;;  %v868_v39 = vld [vmem:[#allocation6 + $0x5d0] sm:$0xff]  ;;  %v727_v40 = vld [vmem:[#allocation6 + $0x498] sm:$0xff] }
  0x88   : > { %605 = vmatpush1.msra.mxu0 %v555_v43  ;;  %1237 = vmatprep.mubr.msk.f32.mxu0 %vm227_vm0, %v585_v57  ;;  %v867_v41 = vld [vmem:[#allocation6 + $0x5c8] sm:$0xff]  ;;  %v726_v42 = vld [vmem:[#allocation6 + $0x490] sm:$0xff]  ;;  %v866_v44 = vld [vmem:[#allocation6 + $0x5c0] sm:$0xff] }
  0x89   : > { %606 = vmatprep.subr.mxu0 %v554_v48  ;;  %763 = vmatpush1.msra.mxu1 %v730_v34  ;;  %v725_v43 = vld [vmem:[#allocation6 + $0x488] sm:$0xff]  ;;  %v724_v45 = vld [vmem:[#allocation6 + $0x480] sm:$0xff]  ;;  %v865_v46 = vld [vmem:[#allocation6 + $0x5b8] sm:$0xff] }
  0x8a   : > { %607 = vmatpush1.msra.mxu0 %v553_v52  ;;  %764 = vmatprep.subr.mxu1 %v729_v36  ;;  %v723_v47 = vld [vmem:[#allocation6 + $0x478] sm:$0xff]  ;;  %v864_v48 = vld [vmem:[#allocation6 + $0x5b0] sm:$0xff]  ;;  %v863_v50 = vld [vmem:[#allocation6 + $0x5a8] sm:$0xff] }
  0x8b   : > { %608 = vmatprep.subr.mxu0 %v552_v53  ;;  %765 = vmatpush1.msra.mxu1 %v728_v38  ;;  %v722_v49 = vld [vmem:[#allocation6 + $0x470] sm:$0xff]  ;;  %v721_v51 = vld [vmem:[#allocation6 + $0x468] sm:$0xff]  ;;  %v862_v52 = vld [vmem:[#allocation6 + $0x5a0] sm:$0xff] }
  0x8c   : > { %609 = vmatpush1.msra.mxu0 %v551_v56  ;;  %766 = vmatprep.subr.mxu1 %v727_v40  ;;  %v720_v53 = vld [vmem:[#allocation6 + $0x460] sm:$0xff]  ;;  %v861_v54 = vld [vmem:[#allocation6 + $0x598] sm:$0xff]  ;;  %v860_v56 = vld [vmem:[#allocation6 + $0x590] sm:$0xff] }
  0x8d   : > { %610 = vmatprep.subr.mxu0 %v550_v58  ;;  %767 = vmatpush1.msra.mxu1 %v726_v42  ;;  %v719_v55 = vld [vmem:[#allocation6 + $0x458] sm:$0xff]  ;;  %v718_v57 = vld [vmem:[#allocation6 + $0x450] sm:$0xff]  ;;  %v859_v58 = vld [vmem:[#allocation6 + $0x588] sm:$0xff] }
  0x8e   : > { %611 = vmatpush1.msra.mxu0 %v549_v59  ;;  %768 = vmatprep.subr.mxu1 %v725_v43  ;;  %v717_v59 = vld [vmem:[#allocation6 + $0x448] sm:$0xff]  ;;  %v708_v14 = vld [vmem:[#allocation6 + $0x400] sm:$0xff]  ;;  %v707_v16 = vld [vmem:[#allocation6 + $0x3f8] sm:$0xff] }
  0x8f   : > { %612 = vmatprep.subr.mxu0 %v548_v60  ;;  %769 = vmatpush1.msra.mxu1 %v724_v45  ;;  %v858_v60 = vld [vmem:[#allocation6 + $0x580] sm:$0xff]  ;;  %v705_v20 = vld [vmem:[#allocation6 + $0x3e8] sm:$0xff]  ;;  %v844_v23 = vld [vmem:[#allocation6 + $0x510] sm:$0xff] }
  0x90   : > { %613 = vmatpush1.msra.mxu0 %v547_v61  ;;  %770 = vmatprep.subr.mxu1 %v723_v47  ;;  %v716_v61 = vld [vmem:[#allocation6 + $0x440] sm:$0xff]  ;;  %v739_v32 = vld [vmem:[#allocation6 + $0x4f8] sm:$0xff]  ;;  %v738_v34 = vld [vmem:[#allocation6 + $0x4f0] sm:$0xff]  ;;  %v237_v47 = vlaneseq }
  0x91   : > { %614 = vmatprep.subr.mxu0 %v546_v62  ;;  %771 = vmatpush1.msra.mxu1 %v722_v49  ;;  %v857_v62 = vld [vmem:[#allocation6 + $0x578] sm:$0xff]  ;;  %v846_v19 = vld [vmem:[#allocation6 + $0x520] sm:$0xff]  ;;  %v737_v36 = vld [vmem:[#allocation6 + $0x4e8] sm:$0xff] }
  0x92   : > { %615 = vmatpush1.msra.mxu0 %v545_v63  ;;  %772 = vmatprep.subr.mxu1 %v721_v51  ;;  %v715_v63 = vld [vmem:[#allocation6 + $0x438] sm:$0xff]  ;;  %v704_v22 = vld [vmem:[#allocation6 + $0x3e0] sm:$0xff]  ;;  %v734_v42 = vld [vmem:[#allocation6 + $0x4d0] sm:$0xff] }
  0x93   : > { %616 = vmatprep.subr.mxu0 %v544_v0  ;;  %773 = vmatpush1.msra.mxu1 %v720_v53  ;;  %v856_v0 = vld [vmem:[#allocation6 + $0x570] sm:$0xff]  ;;  %v842_v27 = vld [vmem:[#allocation6 + $0x500] sm:$0xff]  ;;  %v735_v40 = vld [vmem:[#allocation6 + $0x4d8] sm:$0xff] }
  0x94   : > { %617 = vmatpush1.msra.mxu0 %v543_v1  ;;  %774 = vmatprep.subr.mxu1 %v719_v55  ;;  %v714_v1 = vld [vmem:[#allocation6 + $0x430] sm:$0xff]  ;;  %v736_v38 = vld [vmem:[#allocation6 + $0x4e0] sm:$0xff] }
  0x95   : > { %618 = vmatprep.subr.mxu0 %v542_v2  ;;  %775 = vmatpush1.msra.mxu1 %v718_v57  ;;  %v855_v2 = vld [vmem:[#allocation6 + $0x568] sm:$0xff]  ;;  %v874_v43 = vld [vmem:[#allocation6 + $0x600] sm:$0xff] }
  0x96   : > { %619 = vmatpush1.msra.mxu0 %v541_v3  ;;  %776 = vmatprep.subr.mxu1 %v717_v59  ;;  %v713_v3 = vld [vmem:[#allocation6 + $0x428] sm:$0xff]  ;;  %v732_v45 = vld [vmem:[#allocation6 + $0x4c0] sm:$0xff] }
  0x97   : > { %620 = vmatprep.subr.mxu0 %v540_v4  ;;  %777 = vmatpush1.msra.mxu1 %v716_v61  ;;  %v854_v4 = vld [vmem:[#allocation6 + $0x560] sm:$0xff] }
  0x98   : > { %621 = vmatpush1.msra.mxu0 %v539_v5  ;;  %778 = vmatprep.subr.mxu1 %v715_v63  ;;  %v712_v5 = vld [vmem:[#allocation6 + $0x420] sm:$0xff] }
  0x99   : > { %622 = vmatprep.subr.mxu0 %v538_v6  ;;  %779 = vmatpush1.msra.mxu1 %v714_v1  ;;  %v853_v6 = vld [vmem:[#allocation6 + $0x558] sm:$0xff] }
  0x9a   : > { %623 = vmatpush1.msra.mxu0 %v537_v7  ;;  %v711_v7 = vld [vmem:[#allocation6 + $0x418] sm:$0xff]  ;;  %780 = vmatprep.subr.mxu1 %v713_v3 }
  0x9b   : > { %624 = vmatprep.subr.mxu0 %v536_v8  ;;  %v852_v8 = vld [vmem:[#allocation6 + $0x550] sm:$0xff]  ;;  %781 = vmatpush1.msra.mxu1 %v712_v5 }
  0x9c   : > { %625 = vmatpush1.msra.mxu0 %v535_v9  ;;  %v710_v9 = vld [vmem:[#allocation6 + $0x410] sm:$0xff]  ;;  %782 = vmatprep.subr.mxu1 %v711_v7 }
  0x9d   : > { %626 = vmatprep.subr.mxu0 %v534_v10  ;;  %v851_v10 = vld [vmem:[#allocation6 + $0x548] sm:$0xff]  ;;  %783 = vmatpush1.msra.mxu1 %v710_v9 }
  0x9e   : > { %627 = vmatpush1.msra.mxu0 %v533_v11  ;;  %v850_v11 = vld [vmem:[#allocation6 + $0x540] sm:$0xff] }
  0x9f   : > { %652 = vmatprep.subr.mxu0 %v572_v12  ;;  %v709_v12 = vld [vmem:[#allocation6 + $0x408] sm:$0xff] }
  0xa0   : > { %653 = vmatpush2.msra.mxu0 %v571_v13  ;;  %v849_v13 = vld [vmem:[#allocation6 + $0x538] sm:$0xff]  ;;  %784 = vmatprep.subr.mxu1 %v709_v12 }
  0xa1   : > { %654 = vmatprep.subr.mxu0 %v570_v15  ;;  %v848_v15 = vld [vmem:[#allocation6 + $0x530] sm:$0xff]  ;;  %785 = vmatpush1.msra.mxu1 %v708_v14 }
  0xa2   : > { %655 = vmatpush2.msra.mxu0 %v569_v17  ;;  %v847_v17 = vld [vmem:[#allocation6 + $0x528] sm:$0xff]  ;;  %786 = vmatprep.subr.mxu1 %v707_v16 }
  0xa3   : > { %656 = vmatprep.subr.mxu0 %v568_v18  ;;  %v706_v18 = vld [vmem:[#allocation6 + $0x3f0] sm:$0xff] }
  0xa4   : > { %657 = vmatpush2.msra.mxu0 %v567_v21  ;;  %787 = vmatpush1.msra.mxu1 %v706_v18  ;;  %v845_v21 = vld [vmem:[#allocation6 + $0x518] sm:$0xff]  ;;  %v694_v18 = vld [vmem:[#allocation2 + $0x8] sm:$0xc0] }
  0xa5   : > { %658 = vmatprep.subr.mxu0 %v566_v24  ;;  %788 = vmatprep.subr.mxu1 %v705_v20  ;;  %v703_v24 = vld [vmem:[#allocation6 + $0x3d8] sm:$0xff]  ;;  %v749_v20 = vrot.slane %v694_v18, 6  ;;  %v1003_v18 = vld [vmem:[#allocation6 + $0x740] sm:$0xff] }
  0xa6   : > { %659 = vmatpush2.msra.mxu0 %v565_v25  ;;  %789 = vmatpush1.msra.mxu1 %v704_v22  ;;  %v843_v25 = vld [vmem:[#allocation6 + $0x508] sm:$0xff] }
  0xa7   : > { %661 = vmatmul.mubr.f32.vlgmr.msra.gmra.mxu0 %v582_v26  ;;  %887 = vmatprep.subr.mxu0 %v873_v30  ;;  %v702_v26 = vld [vmem:[#allocation6 + $0x3d0] sm:$0xff]  ;;  %v700_v30 = vld [vmem:[#allocation6 + $0x3c0] sm:$0xff] }
  0xa8   : > { %1238 = vmatprep.mubr.msk.f32.mxu0 %vm227_vm0, %v589_v28  ;;  %888 = vmatpush1.msra.mxu0 %v872_v31  ;;  %v701_v28 = vld [vmem:[#allocation6 + $0x3c8] sm:$0xff]  ;;  %v880_v31 = vld [vmem:[#allocation6 + $0x630] sm:$0xff] }
  0xa9   : > { %889 = vmatprep.subr.mxu0 %v871_v33  ;;  %790 = vmatprep.subr.mxu1 %v703_v24  ;;  %v879_v33 = vld [vmem:[#allocation6 + $0x628] sm:$0xff] }
  0xaa   : > { %890 = vmatpush1.msra.mxu0 %v870_v35  ;;  %791 = vmatpush1.msra.mxu1 %v702_v26  ;;  %v878_v35 = vld [vmem:[#allocation6 + $0x620] sm:$0xff] }
  0xab   : > { %667 = vmatmul.mubr.f32.gmra.mxu0 %v587_v29  ;;  %891 = vmatprep.subr.mxu0 %v869_v37  ;;  %v881_v29 = vld [vmem:[#allocation6 + $0x638] sm:$0xff] }
  0xac   : > { %892 = vmatpush1.msra.mxu0 %v868_v39  ;;  %792 = vmatprep.subr.mxu1 %v701_v28  ;;  %v877_v37 = vld [vmem:[#allocation6 + $0x618] sm:$0xff]  ;;  %v876_v39 = vld [vmem:[#allocation6 + $0x610] sm:$0xff]  ;;  %v1000_v28 = vld [vmem:[#allocation6 + $0x728] sm:$0xff] }
  0xad   : > { %893 = vmatprep.subr.mxu0 %v867_v41  ;;  %793 = vmatpush1.msra.mxu1 %v700_v30  ;;  %v875_v41 = vld [vmem:[#allocation6 + $0x608] sm:$0xff] }
  0xae   : > { %894 = vmatpush1.msra.mxu0 %v866_v44  ;;  %818 = vmatprep.subr.mxu1 %v739_v32  ;;  %v733_v44 = vld [vmem:[#allocation6 + $0x4c8] sm:$0xff] }
  0xaf   : > { %895 = vmatprep.subr.mxu0 %v865_v46  ;;  %819 = vmatpush2.msra.mxu1 %v738_v34  ;;  %v1002_v46 = vld [vmem:[#allocation6 + $0x738] sm:$0xff]  ;;  %v999_v34 = vld [vmem:[#allocation6 + $0x720] sm:$0xff] }
  0xb0   : > { %896 = vmatpush1.msra.mxu0 %v864_v48  ;;  %820 = vmatprep.subr.mxu1 %v737_v36  ;;  %v1708_v48 = vshrl.u32 %v237_v47, 7  ;;  %v992_v47 = vld [vmem:[#allocation6 + $0x6e8] sm:$0xff] }
  0xb1   : > { %897 = vmatprep.subr.mxu0 %v863_v50  ;;  %821 = vmatpush2.msra.mxu1 %v736_v38  ;;  %v235_v50 = vld [vmem:[#allocation8] sm:$0x3] }
  0xb2   : > { %898 = vmatpush1.msra.mxu0 %v862_v52  ;;  %822 = vmatprep.subr.mxu1 %v735_v40  ;;  %v239_v49 = vsub.s32 0, %v1708_v48  ;;  %v243_v52 = vsub.s32 1, %v1708_v48 }
  0xb3   : > { %899 = vmatprep.subr.mxu0 %v861_v54  ;;  %823 = vmatpush2.msra.mxu1 %v734_v42  ;;  %v996_v42 = vld [vmem:[#allocation6 + $0x708] sm:$0xff] }
  0xb4   : > { %900 = vmatpush1.msra.mxu0 %v860_v56  ;;  %824 = vmatprep.subr.mxu1 %v733_v44  ;;  %v240_v53 = vrot.slane %v235_v50, %v239_v49  ;;  %v244_v56 = vrot.slane %v235_v50, %v243_v52  ;;  %v995_v44 = vld [vmem:[#allocation6 + $0x700] sm:$0xff]  ;;  %v989_v52 = vld [vmem:[#allocation6 + $0x6d0] sm:$0xff] }
  0xb5   : > { %901 = vmatprep.subr.mxu0 %v859_v58  ;;  %825 = vmatpush2.msra.mxu1 %v732_v45  ;;  %v994_v45 = vld [vmem:[#allocation6 + $0x6f8] sm:$0xff]  ;;  %v991_v50 = vld [vmem:[#allocation6 + $0x6e0] sm:$0xff] }
  0xb6   : > { %902 = vmatpush1.msra.mxu0 %v858_v60  ;;  %1033 = vmatprep.subr.mxu1 %v1002_v46  ;;  %v993_v46 = vld [vmem:[#allocation6 + $0x6f0] sm:$0xff] }
  0xb7   : > { %903 = vmatprep.subr.mxu0 %v857_v62 }
  0xb8   : > { %904 = vmatpush1.msra.mxu0 %v856_v0 }
  0xb9   : > { %905 = vmatprep.subr.mxu0 %v855_v2 }
  0xba   : > { %906 = vmatpush1.msra.mxu0 %v854_v4 }
  0xbb   : > { %907 = vmatprep.subr.mxu0 %v853_v6 }
  0xbc   : > { %908 = vmatpush1.msra.mxu0 %v852_v8 }
  0xbd   : > { %909 = vmatprep.subr.mxu0 %v851_v10 }
  0xbe   : > { %910 = vmatpush1.msra.mxu0 %v850_v11 }
  0xbf   : > { %911 = vmatprep.subr.mxu0 %v849_v13 }
  0xc0   : > { %912 = vmatpush1.msra.mxu0 %v848_v15 }
  0xc1   : > { %913 = vmatprep.subr.mxu0 %v847_v17 }
  0xc2   : > { %914 = vmatpush1.msra.mxu0 %v846_v19  ;;  %v693_v19 = vld [vmem:[#allocation2] sm:$0xc0] }
  0xc3   : > { %915 = vmatprep.subr.mxu0 %v845_v21 }
  0xc4   : > { %916 = vmatpush1.msra.mxu0 %v844_v23  ;;  %v746_v23 = vrot.slane %v693_v19, 6 }
  0xc5   : > { %917 = vmatprep.subr.mxu0 %v843_v25 }
  0xc6   : > { %918 = vmatpush1.msra.mxu0 %v842_v27  ;;  %v1001_v27 = vld [vmem:[#allocation6 + $0x730] sm:$0xff] }
  0xc7   : > { %943 = vmatprep.subr.mxu0 %v881_v29 }
  0xc8   : > { %944 = vmatpush2.msra.mxu0 %v880_v31 }
  0xc9   : > { %945 = vmatprep.subr.mxu0 %v879_v33 }
  0xca   : > { %946 = vmatpush2.msra.mxu0 %v878_v35 }
  0xcb   : > { %947 = vmatprep.subr.mxu0 %v877_v37  ;;  %v998_v37 = vld [vmem:[#allocation6 + $0x718] sm:$0xff] }
  0xcc   : > { %948 = vmatpush2.msra.mxu0 %v876_v39  ;;  %v997_v39 = vld [vmem:[#allocation6 + $0x710] sm:$0xff] }
  0xcd   : > { %949 = vmatprep.subr.mxu0 %v875_v41 }
  0xce   : > { %950 = vmatpush2.msra.mxu0 %v874_v43 }
 0x13e   : > { %v382_v51 = vpop.f32.mrf.mxu0 }
 0x13f   : > { %v393_v58 = vadd.f32 %v382_v51, %v240_v53  ;;  %v990_v51 = vld [vmem:[#allocation6 + $0x6d8] sm:$0xff] }
 0x140   : > { %v384_v54 = vpop.f32.mrf.mxu0 }
 0x141   : > { %v511_v55 = vpop.f32.mrf.mxu1  ;;  %v394_v60 = vadd.f32 %v384_v54, %v244_v56  ;;  %v987_v54 = vld [vmem:[#allocation6 + $0x6c0] sm:$0xff] }
 0x142   : > { %v522_v63 = vadd.f32 %v511_v55, %v393_v58  ;;  %v986_v55 = vld [vmem:[#allocation6 + $0x6b8] sm:$0xff]  ;;  %v983_v58 = vld [vmem:[#allocation6 + $0x6a0] sm:$0xff] }
 0x143   : > { %v513_v59 = vpop.f32.mrf.mxu1 }
 0x144   : > { %v523_v2 = vadd.f32 %v513_v59, %v394_v60  ;;  %v982_v59 = vld [vmem:[#allocation6 + $0x698] sm:$0xff]  ;;  %v981_v60 = vld [vmem:[#allocation6 + $0x690] sm:$0xff] }
 0x145   : > { %v517_v62 = vpop.f32.mrf.mxu1 }
 0x147   : > { %v388_v57 = vpop.f32.mrf.mxu0  ;;  %v519_v5 = vpop.f32.mrf.mxu1 }
 0x148   : > { %v395_v0 = vadd.f32 %v388_v57, %v240_v53  ;;  %v988_v53 = vld [vmem:[#allocation6 + $0x6c8] sm:$0xff] }
 0x149   : > { %v390_v61 = vpop.f32.mrf.mxu0  ;;  %v984_v57 = vld [vmem:[#allocation6 + $0x6a8] sm:$0xff] }
 0x14a   : > { %v396_v3 = vadd.f32 %v390_v61, %v244_v56  ;;  %v524_v7 = vadd.f32 %v517_v62, %v395_v0  ;;  %v985_v56 = vld [vmem:[#allocation6 + $0x6b0] sm:$0xff]  ;;  %v980_v61 = vld [vmem:[#allocation6 + $0x688] sm:$0xff]  ;;  %v979_v62 = vld [vmem:[#allocation6 + $0x680] sm:$0xff] }
 0x14b   : > { %v977_v0 = vld [vmem:[#allocation6 + $0x670] sm:$0xff] }
 0x14c   : > { %v525_v11 = vadd.f32 %v519_v5, %v396_v3  ;;  %v974_v3 = vld [vmem:[#allocation6 + $0x658] sm:$0xff]  ;;  %v972_v5 = vld [vmem:[#allocation6 + $0x648] sm:$0xff] }
 0x167   : > { %v662_v1 = vpop.f32.mrf.mxu0 }
 0x168   : > { %v673_v4 = vadd.f32 %v662_v1, %v522_v63  ;;  %v978_v63 = vld [vmem:[#allocation6 + $0x678] sm:$0xff]  ;;  %v976_v1 = vld [vmem:[#allocation6 + $0x668] sm:$0xff] }
 0x169   : > { %v664_v6 = vpop.f32.mrf.mxu0 }
 0x16a   : > { %v677_v8 = vmax.f32 %v673_v4, 0.0  ;;  %v674_v9 = vadd.f32 %v664_v6, %v523_v2  ;;  %v975_v2 = vld [vmem:[#allocation6 + $0x660] sm:$0xff]  ;;  %v973_v4 = vld [vmem:[#allocation6 + $0x650] sm:$0xff] }
 0x16b   : > { %v668_v10 = vpop.f32.mrf.mxu0  ;;  %v971_v6 = vld [vmem:[#allocation6 + $0x640] sm:$0xff] }
 0x16c   : > { %681 = vst [vmem:[#allocation2 + $0x10] sm:$0xff] %v677_v8  ;;  %v678_v12 = vmax.f32 %v674_v9, 0.0  ;;  %v675_v13 = vadd.f32 %v668_v10, %v524_v7  ;;  %v747_v22 = vrot.slane %v677_v8, 6  ;;  %v1010_v7 = vld [vmem:[#allocation6 + $0x778] sm:$0xff]  ;;  %v1008_v9 = vld [vmem:[#allocation6 + $0x768] sm:$0xff]  ;;  %v1007_v10 = vld [vmem:[#allocation6 + $0x760] sm:$0xff] }
 0x16d   : > { %v670_v14 = vpop.f32.mrf.mxu0 }
 0x16e   : > { %682 = vst.msk [vmem:[#allocation2 + $0x18] sm:$0xff] %vm227_vm0, %v678_v12  ;;  %v1715_v15 = vmax.f32 %v675_v13, 0.0  ;;  %v676_v16 = vadd.f32 %v670_v14, %v525_v11  ;;  %v748_v29 = vsel %vm299_vm1, %v746_v23, %v747_v22  ;;  %v1006_v12 = vld [vmem:[#allocation6 + $0x758] sm:$0xff]  ;;  %v1005_v14 = vld [vmem:[#allocation6 + $0x750] sm:$0xff] }
 0x16f   : > { %v969_v13 = vld [vmem:[#allocation2 + $0x38] sm:$0x3] }
 0x170   : > { %683 = vst [vmem:[#allocation2 + $0x20] sm:$0xff] %v1715_v15  ;;  %v680_v17 = vmax.f32 %v676_v16, 0.0  ;;  %v1004_v16 = vld [vmem:[#allocation6 + $0x748] sm:$0xff]  ;;  %v1025_v19 = vrot.slane %v969_v13, 2 }
 0x172   : > { %684 = vst.msk [vmem:[#allocation2 + $0x28] sm:$0xff] %vm227_vm0, %v680_v17 }
 0x173   : > { %v964_v11 = vld [vmem:[#allocation2 + $0x10] sm:$0xfc] }
 0x174   : > { %v1017_v17 = vrot.slane %v964_v11, 2 }
 0x175   : > { %v696_v21 = vld [vmem:[#allocation2 + $0x18] sm:$0xff] }
 0x176   : > { %v750_v24 = vrot.slane %v696_v21, 6  ;;  %1241 = vmatprep.mubr.msk.f32.mxu0 %vm227_vm0, %v696_v21  ;;  %v965_v33 = vld [vmem:[#allocation2 + $0x18] sm:$0xfc]  ;;  %v1018_v21 = vrot.slane %v1715_v15, 2 }
 0x177   : > { %952 = vmatmul.mubr.f32.vlgmr.msra.gmra.mxu0 %v677_v8  ;;  %v697_v25 = vld [vmem:[#allocation2 + $0x20] sm:$0x3f]  ;;  %v1020_v40 = vrot.slane %v965_v33, 2  ;;  %v1009_v8 = vld [vmem:[#allocation6 + $0x770] sm:$0xff] }
 0x178   : > { %v751_v26 = vsel %vm299_vm1, %v749_v20, %v750_v24  ;;  %v752_v32 = vrot.slane %v697_v25, 6  ;;  %v968_v20 = vld [vmem:[#allocation2 + $0x30] sm:$0x3] }
 0x179   : > { %1239 = vmatprep.mubr.msk.f32.mxu1 %vm227_vm0, %v751_v26  ;;  %v1723_v30 = vld [vmem:[#allocation2 + $0x28] sm:$0xff]  ;;  %v1023_v23 = vrot.slane %v968_v20, 2 }
 0x17a   : > { %v698_v31 = vld [vmem:[#allocation2 + $0x28] sm:$0x3f]  ;;  %827 = vmatmul.mubr.f32.vlgmr.msra.gmra.mxu1 %v748_v29  ;;  %1242 = vmatprep.mubr.msk.f32.mxu0 %vm227_vm0, %v1723_v30  ;;  %v1021_v36 = vrot.slane %v1723_v30, 2  ;;  %v753_v41 = vsel %vm299_vm1, %v747_v22, %v752_v32  ;;  %v1019_v22 = vsel %vm579_vm2, %v1017_v17, %v1018_v21 }
 0x17b   : > { %v754_v35 = vrot.slane %v698_v31, 6  ;;  %1034 = vmatpush1.msra.mxu1 %v1001_v27  ;;  %957 = vmatmul.mubr.f32.gmra.mxu0 %v1715_v15  ;;  %v1024_v25 = vsel %vm579_vm2, %v1018_v21, %v1023_v23 }
 0x17c   : > { %1035 = vmatprep.subr.mxu1 %v1000_v28  ;;  %v1022_v43 = vsel %vm579_vm2, %v1020_v40, %v1021_v36 }
 0x17d   : > { %v755_v38 = vsel %vm299_vm1, %v750_v24, %v754_v35  ;;  %1036 = vmatpush1.msra.mxu1 %v999_v34  ;;  %v1026_v24 = vsel %vm579_vm2, %v1021_v36, %v1025_v19  ;;  %v686_v34 = vld [vmem:[#allocation8 + $0x2] sm:$0x3] }
 0x17e   : > { %1240 = vmatprep.mubr.msk.f32.mxu1 %vm227_vm0, %v755_v38  ;;  %1037 = vmatprep.subr.mxu1 %v998_v37  ;;  %v691_v30 = vrot.slane %v686_v34, %v239_v49 }
 0x17f   : > { %832 = vmatmul.mubr.f32.gmra.mxu1 %v753_v41 }
 0x180   : > { %1038 = vmatpush1.msra.mxu1 %v997_v39  ;;  %1243 = vmatprep.mubr.msk.f32.mxu1 %vm227_vm0, %v1022_v43 }
 0x181   : > { %1039 = vmatprep.subr.mxu1 %v996_v42 }
 0x182   : > { %1040 = vmatpush1.msra.mxu1 %v995_v44 }
 0x183   : > { %1041 = vmatprep.subr.mxu1 %v994_v45 }
 0x184   : > { %1042 = vmatpush1.msra.mxu1 %v993_v46 }
 0x185   : > { %1043 = vmatprep.subr.mxu1 %v992_v47 }
 0x186   : > { %1044 = vmatpush1.msra.mxu1 %v991_v50 }
 0x187   : > { %1045 = vmatprep.subr.mxu1 %v990_v51 }
 0x188   : > { %1046 = vmatpush1.msra.mxu1 %v989_v52 }
 0x189   : > { %1047 = vmatprep.subr.mxu1 %v988_v53 }
 0x18a   : > { %1048 = vmatpush1.msra.mxu1 %v987_v54 }
 0x18b   : > { %1049 = vmatprep.subr.mxu1 %v986_v55 }
 0x18c   : > { %1050 = vmatpush1.msra.mxu1 %v985_v56 }
 0x18d   : > { %1051 = vmatprep.subr.mxu1 %v984_v57 }
 0x18e   : > { %1052 = vmatpush1.msra.mxu1 %v983_v58 }
 0x18f   : > { %1053 = vmatprep.subr.mxu1 %v982_v59 }
 0x190   : > { %1054 = vmatpush1.msra.mxu1 %v981_v60 }
 0x191   : > { %1055 = vmatprep.subr.mxu1 %v980_v61 }
 0x192   : > { %1056 = vmatpush1.msra.mxu1 %v979_v62 }
 0x193   : > { %1057 = vmatprep.subr.mxu1 %v978_v63 }
 0x194   : > { %1058 = vmatpush1.msra.mxu1 %v977_v0 }
 0x195   : > { %1059 = vmatprep.subr.mxu1 %v976_v1 }
 0x196   : > { %1060 = vmatpush1.msra.mxu1 %v975_v2 }
 0x197   : > { %1061 = vmatprep.subr.mxu1 %v974_v3 }
 0x198   : > { %1062 = vmatpush1.msra.mxu1 %v973_v4 }
 0x199   : > { %1063 = vmatprep.subr.mxu1 %v972_v5 }
 0x19a   : > { %1064 = vmatpush1.msra.mxu1 %v971_v6 }
 0x19b   : > { %1089 = vmatprep.subr.mxu1 %v1010_v7 }
 0x19c   : > { %1090 = vmatpush2.msra.mxu1 %v1009_v8 }
 0x19d   : > { %1091 = vmatprep.subr.mxu1 %v1008_v9 }
 0x19e   : > { %1092 = vmatpush2.msra.mxu1 %v1007_v10 }
 0x19f   : > { %1093 = vmatprep.subr.mxu1 %v1006_v12 }
 0x1a0   : > { %1094 = vmatpush2.msra.mxu1 %v1005_v14 }
 0x1a1   : > { %1095 = vmatprep.subr.mxu1 %v1004_v16 }
 0x1a2   : > { %1096 = vmatpush2.msra.mxu1 %v1003_v18 }
 0x1a3   : > { %1098 = vmatmul.mubr.f32.vlgmr.msra.gmra.mxu1 %v1019_v22 }
 0x1a4   : > { %1244 = vmatprep.mubr.msk.f32.mxu1 %vm227_vm0, %v1026_v24 }
 0x1a7   : > { %1103 = vmatmul.mubr.f32.gmra.mxu1 %v1024_v25 }
 0x237   : > { %v953_v26 = vpop.f32.mrf.mxu0 }
 0x239   : > { %v955_v27 = vpop.f32.mrf.mxu0 }
 0x23a   : > { %v828_v28 = vpop.f32.mrf.mxu1 }
 0x23b   : > { %v958_v15 = vpop.f32.mrf.mxu0  ;;  %v837_v35 = vadd.f32 %v828_v28, %v691_v30 }
 0x23c   : > { %v830_v29 = vpop.f32.mrf.mxu1 }
 0x23d   : > { %v960_v31 = vpop.f32.mrf.mxu0  ;;  %v962_v37 = vadd.f32 %v953_v26, %v837_v35 }
 0x23f   : > { %v833_v32 = vpop.f32.mrf.mxu1 }
 0x240   : > { %v838_v36 = vadd.f32 %v833_v32, %v691_v30 }
 0x241   : > { %v835_v33 = vpop.f32.mrf.mxu1 }
 0x242   : > { %v963_v42 = vadd.f32 %v958_v15, %v838_v36 }
 0x263   : > { %v1099_v38 = vpop.f32.mrf.mxu1 }
 0x264   : > { %v1108_v39 = vadd.f32 %v1099_v38, %v962_v37 }
 0x265   : > { %v1101_v40 = vpop.f32.mrf.mxu1 }
 0x266   : > { %v1110_v41 = vmax.f32 %v1108_v39, 0.0 }
 0x267   : > { %v1104_v43 = vpop.f32.mrf.mxu1 }
 0x268   : > { %1112 = vst [vmem:[%s217_s20] sm:$0xff] %v1110_v41  ;;  %v1109_v48 = vadd.f32 %v1104_v43, %v963_v42 }
 0x269   : > { %v1106_v49 = vpop.f32.mrf.mxu1 }
 0x26a   : > { %v1111_v44 = vmax.f32 %v1109_v48, 0.0 }
 0x26c   : > { %1113 = vst [vmem:[%s217_s20 + $0x8] sm:$0xff] %v1111_v44 }
 0x26d   : > { %1418 = shalt.err (!%p1415_p3)
}
 0x26e   : > { %s1419_s25 = scalar_lea.hbm %s1752_s5, 256  ;;  %s1423_s8 = scalar_lea.hbm %s1798_s3, 512 }
 0x26f   : > { %p1420_p11 = scmp.ne.s32.totalorder %s1752_s5, %s1419_s25  ;;  %p1424_p4 = scmp.lt.s32.totalorder %s1752_s5, %s1798_s3 }
 0x270   : > { %p1425_p6 = scmp.lt.s32.totalorder %s1423_s8, %s1419_s25 }
 0x271   : > { %p1421_p9 = pnand %p1420_p11, %p1813_p2 }
 0x272   : > { %p1426_p8 = por %p1425_p6, %p1424_p4 }
 0x273   : > { %p1422_p1 = pneg %p1421_p9 }
 0x275   : > { %p1427_p10 = pnand %p1426_p8, %p1422_p1 }
 0x277   : > { %1430 = shalt.err (!%p1427_p10)
}
 0x278   : > { %s1483_s18 = smov 128   ;;  %s1484_s20 = smov 8  }
 0x279   : > { %1262 = dma.vmem_to_hbm [thread:$0]  (%p1813_p2), %s1747_s27, 256, %s1752_s5, %s1115_s6, %s1483_s18, %s1483_s18, %s1484_s20  }
 0x27a PF: > { %s1143_s28 = sand.u32 1, %s1461_s12   ;;  %p1814_p7 = scmp.ne.s32.totalorder %s1804_s19, 0 }
 0x27b   : > { %p1815_p12 = scmp.ge.s32.totalorder %s1473_s15, 2  ;;  %s1144_s29 = scalar_lea.sflag [#allocation5], %s1143_s28 }
 0x27d   : > { %p1276_p13 = pnand %p1815_p12, %p1814_p7 }
 0x27f   : > { %p1277_p0 = pneg %p1276_p13 }
 0x281   : > { %1456 = dma.done.wait (%p1277_p0), %s1144_s29, 256  }
 0x282   : > { %1458 = vsyncadd (%p1277_p0), %s1144_s29, 4294967040  ;;  %p17_p5 = scmp.ge.s32.totalorder %s1580_s9, 4   ;;  %s1816_s12 = smov %s1465_s13 }
 0x283   : > { %s1817_s13 = smov %s1469_s14  ;;  %s1818_s14 = smov %s1589_s17 }
 0x284   : > { %s1819_s15 = smov %s1580_s9  ;;  %19 = sbr.rel (!%p17_p5) target bundleno = 6 (0x6), region = 91 }
 0x289   :  { %1149 = vsyncpa [#allocation4], 1 }
 0x28a   :  { %1151 = vsyncpa [#allocation4 + $0x1], 1 }
 0x28b   :  { %1152 = vsyncpa [#allocation7], 1 }
 0x28c   :  { %1153 = vsyncpa [#allocation5], 1 }
 0x28d   :  { %1155 = vsyncpa [#allocation5 + $0x1], 1 }

</bundles_post_ra>
